<compile_context>
chip_gen: v7x
topology: tpu7x:2x2x1
jax: 0.10.0
libtpu: 0.0.40
codegen_flags: <defaults>
</compile_context>

<pallas_src>
import functools

import jax
import jax.numpy as jnp
from jax import lax
from jax.experimental import pallas as pl
from jax.experimental.pallas import tpu as pltpu


# --------------------------------------------------------------------------
# Pallas kernel: one batch element per grid step, two MXU matmuls total.
# --------------------------------------------------------------------------
def _resblock_kernel(mask_ref, x_ref, w1_ref, b1_ref, w2_ref, b2_ref, br_ref,
                     o_ref, xk1_ref, xk2_ref, *, W, compute_dtype):
    """Refs:
      mask_ref : (9, L)             0/1 tap-validity mask (image borders)
      x_ref    : (Cin, L)           input, L = H*W flattened (lane-dense)
      w1_ref   : (Med+Cout, 9*Cin)  conv1 weights (BN1 scale folded) stacked
                                    with the residual 1x1 weights
      b1_ref   : (Med, 1)           folded conv1-bias + BN1 bias
      w2_ref   : (Cout, 9*Med)      conv2 weights (BN2 scale folded)
      b2_ref   : (Cout, 1)          folded conv2-bias + BN2 bias
      br_ref   : (Cout, 1)          residual conv bias
      o_ref    : (Cout, L)          output (lane-dense store)
      xk1_ref  : (9*Cin, L)         VMEM scratch: im2col of x
      xk2_ref  : (9*Med, L)         VMEM scratch: im2col of relu(conv1)
    """
    _, L = x_ref.shape
    Med = b1_ref.shape[0]
    # Flat shift of each 3x3 tap, ky-major / kx-minor (matches weight layout).
    shifts = [((ky - 1) * W + (kx - 1)) % L
              for ky in range(3) for kx in range(3)]
    mask = mask_ref[...]                                   # (9, L)

    def im2col_into(xk_ref, act):
        """Write the (9*C, L) im2col matrix of `act` (C, L) into xk_ref."""
        C = act.shape[0]
        # Doubling along lanes (aligned 256|256 concat) lets every tap be a
        # simple static slice; wrapped positions are zeroed by the mask.
        xx = jnp.concatenate([act, act], axis=1)           # (C, 2L)
        for t, s in enumerate(shifts):
            xk_ref[t * C:(t + 1) * C, :] = xx[:, s:s + L] * mask[t:t + 1, :]

    # ---- conv1 (+ residual 1x1 folded in): a single MXU matmul -------------
    im2col_into(xk1_ref, x_ref[...].astype(compute_dtype))
    a1 = jnp.dot(w1_ref[...], xk1_ref[...],
                 preferred_element_type=jnp.float32)        # (Med+Cout, L)
    y1 = jnp.maximum(a1[:Med, :] + b1_ref[...], 0.0)        # BN1 bias + ReLU
    res = a1[Med:, :] + br_ref[...]                         # residual branch

    # ---- conv2: a single MXU matmul ----------------------------------------
    im2col_into(xk2_ref, y1.astype(compute_dtype))
    a2 = jnp.dot(w2_ref[...], xk2_ref[...],
                 preferred_element_type=jnp.float32)        # (Cout, L)
    y2 = jnp.maximum(a2 + b2_ref[...], 0.0)                 # BN2 bias + ReLU

    o_ref[...] = (y2 + res).astype(o_ref.dtype)             # lane-dense store


# --------------------------------------------------------------------------
# Wrapper: fold BN into weights, build im2col weight layout, call the kernel.
# Takes PyTorch-layout (NCHW / OIHW) parameters; only free reshapes on x.
# --------------------------------------------------------------------------
@functools.partial(jax.jit, static_argnames=("compute_dtype",))
def resblock_forward(x_nchw, w1_oihw, cb1, g1, be1, m1, v1,
                     w2_oihw, cb2, g2, be2, m2, v2, wr_oihw, br,
                     eps=1e-5, compute_dtype=jnp.float32):
    f32 = jnp.float32
    N, Cin, H, W = x_nchw.shape
    Med = w1_oihw.shape[0]
    Cout = w2_oihw.shape[0]
    L = H * W

    # ---- fold conv bias + BatchNorm (running stats) into scale / bias ------
    s1 = (g1 / jnp.sqrt(v1 + eps)).astype(f32)
    b1 = (be1 + (cb1 - m1) * s1).astype(f32)
    s2 = (g2 / jnp.sqrt(v2 + eps)).astype(f32)
    b2 = (be2 + (cb2 - m2) * s2).astype(f32)

    # ---- conv weights -> im2col layout, BN scale folded into the weights ---
    # column order k = (3*ky + kx)*Ci + ci  (matches the kernel's tap order)
    w1k = (jnp.transpose(w1_oihw, (0, 2, 3, 1)).reshape(Med, 9 * Cin)
           * s1[:, None])
    w2k = (jnp.transpose(w2_oihw, (0, 2, 3, 1)).reshape(Cout, 9 * Med)
           * s2[:, None]).astype(compute_dtype)
    # Residual 1x1 conv becomes extra output rows of conv1's weight, living
    # only in the centre-tap (ky = kx = 1 -> tap index 4) columns.
    wres = jnp.zeros((Cout, 9 * Cin), f32)
    wres = wres.at[:, 4 * Cin:5 * Cin].set(wr_oihw[:, :, 0, 0].astype(f32))
    w1e = jnp.concatenate([w1k, wres], axis=0).astype(compute_dtype)

    b1c = b1.reshape(Med, 1)
    b2c = b2.reshape(Cout, 1)
    brc = br.astype(f32).reshape(Cout, 1)

    # ---- per-tap border-validity mask (realizes SAME zero padding) ---------
    idx = jnp.arange(L, dtype=jnp.int32)
    row, col = idx // W, idx % W
    masks = []
    for ky in range(3):
        for kx in range(3):
            dy, dx = ky - 1, kx - 1
            masks.append((row + dy >= 0) & (row + dy < H)
                         & (col + dx >= 0) & (col + dx < W))
    tap_mask = jnp.stack(masks, axis=0).astype(compute_dtype)      # (9, L)

    # ---- activations: NCHW -> (N, C, H*W); a free, contiguous reshape ------
    x2 = x_nchw.astype(f32).reshape(N, Cin, L)

    full = lambda shape: pl.BlockSpec(shape, lambda n: (0,) * len(shape))

    out = pl.pallas_call(
        functools.partial(_resblock_kernel, W=W, compute_dtype=compute_dtype),
        out_shape=jax.ShapeDtypeStruct((N, Cout, L), f32),
        grid_spec=pltpu.PrefetchScalarGridSpec(
            num_scalar_prefetch=0,
            grid=(N,),                       # one image / step, megacore-able
            in_specs=[
                full((9, L)),                                    # tap_mask
                pl.BlockSpec((pl.Squeezed(), Cin, L),
                             lambda n: (n, 0, 0)),               # x
                full((Med + Cout, 9 * Cin)),                     # w1 (+res)
                full((Med, 1)),                                  # b1
                full((Cout, 9 * Med)),                           # w2
                full((Cout, 1)),                                 # b2
                full((Cout, 1)),                                 # br
            ],
            out_specs=pl.BlockSpec((pl.Squeezed(), Cout, L),
                                   lambda n: (n, 0, 0)),
            scratch_shapes=[
                pltpu.VMEM((9 * Cin, L), compute_dtype),         # im2col #1
                pltpu.VMEM((9 * Med, L), compute_dtype),         # im2col #2
            ],
        ),
        compiler_params=pltpu.CompilerParams(
            dimension_semantics=("parallel",)),
    )(tap_mask, x2, w1e, b1c, w2k, b2c, brc)

    # (N, Cout, H*W) -> NCHW: again a free, contiguous reshape (no transpose).
    return out.reshape(N, Cout, H, W)


# --------------------------------------------------------------------------
# Pure-JAX reference (lax.conv, NCHW/OIHW) for verification.
# --------------------------------------------------------------------------
def resblock_ref(x, w1_oihw, cb1, g1, be1, m1, v1,
                 w2_oihw, cb2, g2, be2, m2, v2, wr_oihw, br, eps=1e-5):
    def bn(y, g, b, m, v):
        rs = lambda a: a.reshape(1, -1, 1, 1)
        return (y - rs(m)) / jnp.sqrt(rs(v) + eps) * rs(g) + rs(b)

    y = lax.conv(x, w1_oihw, (1, 1), "SAME") + cb1.reshape(1, -1, 1, 1)
    y = jax.nn.relu(bn(y, g1, be1, m1, v1))
    y = lax.conv(y, w2_oihw, (1, 1), "SAME") + cb2.reshape(1, -1, 1, 1)
    y = jax.nn.relu(bn(y, g2, be2, m2, v2))
    res = lax.conv(x, wr_oihw, (1, 1), "VALID") + br.reshape(1, -1, 1, 1)
    return y + res


if __name__ == "__main__":
    # ResBlock(In_channel=4, Med_channel=8, Out_channel=8, DownSample=False)
    N, Cin, Med, Cout, H, W = 2, 4, 8, 8, 16, 16
    eps = 1e-5

    key = jax.random.PRNGKey(0)
    ks = jax.random.split(key, 16)

    x = jax.random.normal(ks[0], (N, Cin, H, W), jnp.float32)

    # conv weights (PyTorch OIHW layout) + biases
    w1_oihw = jax.random.normal(ks[1], (Med, Cin, 3, 3), jnp.float32) * 0.2
    cb1 = jax.random.normal(ks[2], (Med,), jnp.float32) * 0.1
    w2_oihw = jax.random.normal(ks[3], (Cout, Med, 3, 3), jnp.float32) * 0.2
    cb2 = jax.random.normal(ks[4], (Cout,), jnp.float32) * 0.1
    wr_oihw = jax.random.normal(ks[5], (Cout, Cin, 1, 1), jnp.float32) * 0.2
    br = jax.random.normal(ks[6], (Cout,), jnp.float32) * 0.1

    # BatchNorm (inference) parameters / running stats
    g1 = 1.0 + 0.1 * jax.random.normal(ks[7], (Med,), jnp.float32)
    be1 = 0.1 * jax.random.normal(ks[8], (Med,), jnp.float32)
    m1 = 0.1 * jax.random.normal(ks[9], (Med,), jnp.float32)
    v1 = 1.0 + 0.1 * jax.random.uniform(ks[10], (Med,), jnp.float32)
    g2 = 1.0 + 0.1 * jax.random.normal(ks[11], (Cout,), jnp.float32)
    be2 = 0.1 * jax.random.normal(ks[12], (Cout,), jnp.float32)
    m2 = 0.1 * jax.random.normal(ks[13], (Cout,), jnp.float32)
    v2 = 1.0 + 0.1 * jax.random.uniform(ks[14], (Cout,), jnp.float32)

    out = resblock_forward(x, w1_oihw, cb1, g1, be1, m1, v1,
                           w2_oihw, cb2, g2, be2, m2, v2, wr_oihw, br)
    out = jax.block_until_ready(out)

    ref = resblock_ref(x, w1_oihw, cb1, g1, be1, m1, v1,
                       w2_oihw, cb2, g2, be2, m2, v2, wr_oihw, br, eps)
    ref = jax.block_until_ready(ref)

    assert out.shape == (N, Cout, H, W), out.shape
    err = float(jnp.max(jnp.abs(out - ref)))
    assert jnp.allclose(out, ref, rtol=2e-4, atol=2e-4), err

    print("KERNEL_OK")
</pallas_src>

<mosaic_0001>
module attributes {stable_mosaic.version = 11 : i64} {
  func.func @_resblock_kernel(%arg0: i32, %arg1: memref<9x256xf32, #tpu.memory_space<vmem>>, %arg2: memref<1x4x256xf32, #tpu.memory_space<vmem>>, %arg3: memref<16x36xf32, #tpu.memory_space<vmem>>, %arg4: memref<8x1xf32, #tpu.memory_space<vmem>>, %arg5: memref<8x72xf32, #tpu.memory_space<vmem>>, %arg6: memref<8x1xf32, #tpu.memory_space<vmem>>, %arg7: memref<8x1xf32, #tpu.memory_space<vmem>>, %arg8: memref<1x8x256xf32, #tpu.memory_space<vmem>>, %arg9: memref<36x256xf32, #tpu.memory_space<vmem>>, %arg10: memref<72x256xf32, #tpu.memory_space<vmem>>) attributes {dimension_semantics = [#tpu.dimension_semantics<parallel>], iteration_bounds = array<i64: 2>, scalar_prefetch = 0 : i64, scratch_operands = 2 : i64, tpu.core_type = #tpu.core_type<tc>, window_params = [{pipeline_mode = #tpu.pipeline_mode<synchronous>, transform_indices = @transform_0, window_bounds = array<i64: 9, 256>}, {transform_indices = @transform_1, window_bounds = array<i64: 1, 4, 256>}, {pipeline_mode = #tpu.pipeline_mode<synchronous>, transform_indices = @transform_2, window_bounds = array<i64: 16, 36>}, {pipeline_mode = #tpu.pipeline_mode<synchronous>, transform_indices = @transform_3, window_bounds = array<i64: 8, 1>}, {pipeline_mode = #tpu.pipeline_mode<synchronous>, transform_indices = @transform_4, window_bounds = array<i64: 8, 72>}, {pipeline_mode = #tpu.pipeline_mode<synchronous>, transform_indices = @transform_5, window_bounds = array<i64: 8, 1>}, {pipeline_mode = #tpu.pipeline_mode<synchronous>, transform_indices = @transform_6, window_bounds = array<i64: 8, 1>}, {transform_indices = @transform_7, window_bounds = array<i64: 1, 8, 256>}]} {
    %c0 = arith.constant 0 : index
    %c0_0 = arith.constant 0 : index
    %0 = vector.load %arg1[%c0, %c0_0] : memref<9x256xf32, #tpu.memory_space<vmem>>, vector<9x256xf32>
    %c0_1 = arith.constant 0 : index
    %c0_2 = arith.constant 0 : index
    %c0_3 = arith.constant 0 : index
    %1 = vector.load %arg2[%c0_1, %c0_2, %c0_3] : memref<1x4x256xf32, #tpu.memory_space<vmem>>, vector<1x4x256xf32>
    %2 = vector.shape_cast %1 : vector<1x4x256xf32> to vector<4x256xf32>
    %3 = tpu.concatenate %2, %2 in 1 : vector<4x256xf32>, vector<4x256xf32> -> vector<4x512xf32>
    %4 = vector.extract_strided_slice %3 {offsets = [0, 239], sizes = [4, 256], strides = [1, 1]} : vector<4x512xf32> to vector<4x256xf32>
    %5 = vector.extract_strided_slice %0 {offsets = [0, 0], sizes = [1, 256], strides = [1, 1]} : vector<9x256xf32> to vector<1x256xf32>
    %6 = vector.broadcast %5 : vector<1x256xf32> to vector<4x256xf32>
    %7 = arith.mulf %4, %6 : vector<4x256xf32>
    %c0_4 = arith.constant 0 : index
    %c0_5 = arith.constant 0 : index
    %8 = vector.load %arg9[%c0_4, %c0_5] : memref<36x256xf32, #tpu.memory_space<vmem>>, vector<4x256xf32>
    tpu.vector_store %arg9[%c0_4, %c0_5], %7 {strides = array<i32>} : memref<36x256xf32, #tpu.memory_space<vmem>>, vector<4x256xf32>,
    %9 = vector.extract_strided_slice %3 {offsets = [0, 240], sizes = [4, 256], strides = [1, 1]} : vector<4x512xf32> to vector<4x256xf32>
    %10 = vector.extract_strided_slice %0 {offsets = [1, 0], sizes = [1, 256], strides = [1, 1]} : vector<9x256xf32> to vector<1x256xf32>
    %11 = vector.broadcast %10 : vector<1x256xf32> to vector<4x256xf32>
    %12 = arith.mulf %9, %11 : vector<4x256xf32>
    %c4 = arith.constant 4 : index
    %c0_6 = arith.constant 0 : index
    %13 = vector.load %arg9[%c4, %c0_6] : memref<36x256xf32, #tpu.memory_space<vmem>>, vector<4x256xf32>
    tpu.vector_store %arg9[%c4, %c0_6], %12 {strides = array<i32>} : memref<36x256xf32, #tpu.memory_space<vmem>>, vector<4x256xf32>,
    %14 = vector.extract_strided_slice %3 {offsets = [0, 241], sizes = [4, 256], strides = [1, 1]} : vector<4x512xf32> to vector<4x256xf32>
    %15 = vector.extract_strided_slice %0 {offsets = [2, 0], sizes = [1, 256], strides = [1, 1]} : vector<9x256xf32> to vector<1x256xf32>
    %16 = vector.broadcast %15 : vector<1x256xf32> to vector<4x256xf32>
    %17 = arith.mulf %14, %16 : vector<4x256xf32>
    %c8 = arith.constant 8 : index
    %c0_7 = arith.constant 0 : index
    %18 = vector.load %arg9[%c8, %c0_7] : memref<36x256xf32, #tpu.memory_space<vmem>>, vector<4x256xf32>
    tpu.vector_store %arg9[%c8, %c0_7], %17 {strides = array<i32>} : memref<36x256xf32, #tpu.memory_space<vmem>>, vector<4x256xf32>,
    %19 = vector.extract_strided_slice %3 {offsets = [0, 255], sizes = [4, 256], strides = [1, 1]} : vector<4x512xf32> to vector<4x256xf32>
    %20 = vector.extract_strided_slice %0 {offsets = [3, 0], sizes = [1, 256], strides = [1, 1]} : vector<9x256xf32> to vector<1x256xf32>
    %21 = vector.broadcast %20 : vector<1x256xf32> to vector<4x256xf32>
    %22 = arith.mulf %19, %21 : vector<4x256xf32>
    %c12 = arith.constant 12 : index
    %c0_8 = arith.constant 0 : index
    %23 = vector.load %arg9[%c12, %c0_8] : memref<36x256xf32, #tpu.memory_space<vmem>>, vector<4x256xf32>
    tpu.vector_store %arg9[%c12, %c0_8], %22 {strides = array<i32>} : memref<36x256xf32, #tpu.memory_space<vmem>>, vector<4x256xf32>,
    %24 = vector.extract_strided_slice %3 {offsets = [0, 0], sizes = [4, 256], strides = [1, 1]} : vector<4x512xf32> to vector<4x256xf32>
    %25 = vector.extract_strided_slice %0 {offsets = [4, 0], sizes = [1, 256], strides = [1, 1]} : vector<9x256xf32> to vector<1x256xf32>
    %26 = vector.broadcast %25 : vector<1x256xf32> to vector<4x256xf32>
    %27 = arith.mulf %24, %26 : vector<4x256xf32>
    %c16 = arith.constant 16 : index
    %c0_9 = arith.constant 0 : index
    %28 = vector.load %arg9[%c16, %c0_9] : memref<36x256xf32, #tpu.memory_space<vmem>>, vector<4x256xf32>
    tpu.vector_store %arg9[%c16, %c0_9], %27 {strides = array<i32>} : memref<36x256xf32, #tpu.memory_space<vmem>>, vector<4x256xf32>,
    %29 = vector.extract_strided_slice %3 {offsets = [0, 1], sizes = [4, 256], strides = [1, 1]} : vector<4x512xf32> to vector<4x256xf32>
    %30 = vector.extract_strided_slice %0 {offsets = [5, 0], sizes = [1, 256], strides = [1, 1]} : vector<9x256xf32> to vector<1x256xf32>
    %31 = vector.broadcast %30 : vector<1x256xf32> to vector<4x256xf32>
    %32 = arith.mulf %29, %31 : vector<4x256xf32>
    %c20 = arith.constant 20 : index
    %c0_10 = arith.constant 0 : index
    %33 = vector.load %arg9[%c20, %c0_10] : memref<36x256xf32, #tpu.memory_space<vmem>>, vector<4x256xf32>
    tpu.vector_store %arg9[%c20, %c0_10], %32 {strides = array<i32>} : memref<36x256xf32, #tpu.memory_space<vmem>>, vector<4x256xf32>,
    %34 = vector.extract_strided_slice %3 {offsets = [0, 15], sizes = [4, 256], strides = [1, 1]} : vector<4x512xf32> to vector<4x256xf32>
    %35 = vector.extract_strided_slice %0 {offsets = [6, 0], sizes = [1, 256], strides = [1, 1]} : vector<9x256xf32> to vector<1x256xf32>
    %36 = vector.broadcast %35 : vector<1x256xf32> to vector<4x256xf32>
    %37 = arith.mulf %34, %36 : vector<4x256xf32>
    %c24 = arith.constant 24 : index
    %c0_11 = arith.constant 0 : index
    %38 = vector.load %arg9[%c24, %c0_11] : memref<36x256xf32, #tpu.memory_space<vmem>>, vector<4x256xf32>
    tpu.vector_store %arg9[%c24, %c0_11], %37 {strides = array<i32>} : memref<36x256xf32, #tpu.memory_space<vmem>>, vector<4x256xf32>,
    %39 = vector.extract_strided_slice %3 {offsets = [0, 16], sizes = [4, 256], strides = [1, 1]} : vector<4x512xf32> to vector<4x256xf32>
    %40 = vector.extract_strided_slice %0 {offsets = [7, 0], sizes = [1, 256], strides = [1, 1]} : vector<9x256xf32> to vector<1x256xf32>
    %41 = vector.broadcast %40 : vector<1x256xf32> to vector<4x256xf32>
    %42 = arith.mulf %39, %41 : vector<4x256xf32>
    %c28 = arith.constant 28 : index
    %c0_12 = arith.constant 0 : index
    %43 = vector.load %arg9[%c28, %c0_12] : memref<36x256xf32, #tpu.memory_space<vmem>>, vector<4x256xf32>
    tpu.vector_store %arg9[%c28, %c0_12], %42 {strides = array<i32>} : memref<36x256xf32, #tpu.memory_space<vmem>>, vector<4x256xf32>,
    %44 = vector.extract_strided_slice %3 {offsets = [0, 17], sizes = [4, 256], strides = [1, 1]} : vector<4x512xf32> to vector<4x256xf32>
    %45 = vector.extract_strided_slice %0 {offsets = [8, 0], sizes = [1, 256], strides = [1, 1]} : vector<9x256xf32> to vector<1x256xf32>
    %46 = vector.broadcast %45 : vector<1x256xf32> to vector<4x256xf32>
    %47 = arith.mulf %44, %46 : vector<4x256xf32>
    %c32 = arith.constant 32 : index
    %c0_13 = arith.constant 0 : index
    %48 = vector.load %arg9[%c32, %c0_13] : memref<36x256xf32, #tpu.memory_space<vmem>>, vector<4x256xf32>
    tpu.vector_store %arg9[%c32, %c0_13], %47 {strides = array<i32>} : memref<36x256xf32, #tpu.memory_space<vmem>>, vector<4x256xf32>,
    %c0_14 = arith.constant 0 : index
    %c0_15 = arith.constant 0 : index
    %49 = vector.load %arg3[%c0_14, %c0_15] : memref<16x36xf32, #tpu.memory_space<vmem>>, vector<16x36xf32>
    %c0_16 = arith.constant 0 : index
    %c0_17 = arith.constant 0 : index
    %50 = vector.load %arg9[%c0_16, %c0_17] : memref<36x256xf32, #tpu.memory_space<vmem>>, vector<36x256xf32>
    %cst = arith.constant dense<0.000000e+00> : vector<16x256xf32>
    %51 = tpu.matmul %49, %50, %cst {dimension_numbers = #tpu.dot_dimension_numbers<[1], [0], [0], [1], [0, 0, 1, 1], [], []>} : vector<16x36xf32>, vector<36x256xf32>, vector<16x256xf32> -> vector<16x256xf32>
    %52 = vector.extract_strided_slice %51 {offsets = [0, 0], sizes = [8, 256], strides = [1, 1]} : vector<16x256xf32> to vector<8x256xf32>
    %c0_18 = arith.constant 0 : index
    %c0_19 = arith.constant 0 : index
    %53 = vector.load %arg4[%c0_18, %c0_19] : memref<8x1xf32, #tpu.memory_space<vmem>>, vector<8x1xf32>
    %54 = vector.broadcast %53 : vector<8x1xf32> to vector<8x256xf32>
    %55 = arith.addf %52, %54 : vector<8x256xf32>
    %cst_20 = arith.constant 0.000000e+00 : f32
    %56 = vector.broadcast %cst_20 : f32 to vector<8x256xf32>
    %57 = arith.maximumf %55, %56 : vector<8x256xf32>
    %58 = vector.extract_strided_slice %51 {offsets = [8, 0], sizes = [8, 256], strides = [1, 1]} : vector<16x256xf32> to vector<8x256xf32>
    %c0_21 = arith.constant 0 : index
    %c0_22 = arith.constant 0 : index
    %59 = vector.load %arg7[%c0_21, %c0_22] : memref<8x1xf32, #tpu.memory_space<vmem>>, vector<8x1xf32>
    %60 = vector.broadcast %59 : vector<8x1xf32> to vector<8x256xf32>
    %61 = arith.addf %58, %60 : vector<8x256xf32>
    %62 = tpu.concatenate %57, %57 in 1 : vector<8x256xf32>, vector<8x256xf32> -> vector<8x512xf32>
    %63 = vector.extract_strided_slice %62 {offsets = [0, 239], sizes = [8, 256], strides = [1, 1]} : vector<8x512xf32> to vector<8x256xf32>
    %64 = vector.extract_strided_slice %0 {offsets = [0, 0], sizes = [1, 256], strides = [1, 1]} : vector<9x256xf32> to vector<1x256xf32>
    %65 = vector.broadcast %64 : vector<1x256xf32> to vector<8x256xf32>
    %66 = arith.mulf %63, %65 : vector<8x256xf32>
    %c0_23 = arith.constant 0 : index
    %c0_24 = arith.constant 0 : index
    %67 = vector.load %arg10[%c0_23, %c0_24] : memref<72x256xf32, #tpu.memory_space<vmem>>, vector<8x256xf32>
    tpu.vector_store %arg10[%c0_23, %c0_24], %66 {strides = array<i32>} : memref<72x256xf32, #tpu.memory_space<vmem>>, vector<8x256xf32>,
    %68 = vector.extract_strided_slice %62 {offsets = [0, 240], sizes = [8, 256], strides = [1, 1]} : vector<8x512xf32> to vector<8x256xf32>
    %69 = vector.extract_strided_slice %0 {offsets = [1, 0], sizes = [1, 256], strides = [1, 1]} : vector<9x256xf32> to vector<1x256xf32>
    %70 = vector.broadcast %69 : vector<1x256xf32> to vector<8x256xf32>
    %71 = arith.mulf %68, %70 : vector<8x256xf32>
    %c8_25 = arith.constant 8 : index
    %c0_26 = arith.constant 0 : index
    %72 = vector.load %arg10[%c8_25, %c0_26] : memref<72x256xf32, #tpu.memory_space<vmem>>, vector<8x256xf32>
    tpu.vector_store %arg10[%c8_25, %c0_26], %71 {strides = array<i32>} : memref<72x256xf32, #tpu.memory_space<vmem>>, vector<8x256xf32>,
    %73 = vector.extract_strided_slice %62 {offsets = [0, 241], sizes = [8, 256], strides = [1, 1]} : vector<8x512xf32> to vector<8x256xf32>
    %74 = vector.extract_strided_slice %0 {offsets = [2, 0], sizes = [1, 256], strides = [1, 1]} : vector<9x256xf32> to vector<1x256xf32>
    %75 = vector.broadcast %74 : vector<1x256xf32> to vector<8x256xf32>
    %76 = arith.mulf %73, %75 : vector<8x256xf32>
    %c16_27 = arith.constant 16 : index
    %c0_28 = arith.constant 0 : index
    %77 = vector.load %arg10[%c16_27, %c0_28] : memref<72x256xf32, #tpu.memory_space<vmem>>, vector<8x256xf32>
    tpu.vector_store %arg10[%c16_27, %c0_28], %76 {strides = array<i32>} : memref<72x256xf32, #tpu.memory_space<vmem>>, vector<8x256xf32>,
    %78 = vector.extract_strided_slice %62 {offsets = [0, 255], sizes = [8, 256], strides = [1, 1]} : vector<8x512xf32> to vector<8x256xf32>
    %79 = vector.extract_strided_slice %0 {offsets = [3, 0], sizes = [1, 256], strides = [1, 1]} : vector<9x256xf32> to vector<1x256xf32>
    %80 = vector.broadcast %79 : vector<1x256xf32> to vector<8x256xf32>
    %81 = arith.mulf %78, %80 : vector<8x256xf32>
    %c24_29 = arith.constant 24 : index
    %c0_30 = arith.constant 0 : index
    %82 = vector.load %arg10[%c24_29, %c0_30] : memref<72x256xf32, #tpu.memory_space<vmem>>, vector<8x256xf32>
    tpu.vector_store %arg10[%c24_29, %c0_30], %81 {strides = array<i32>} : memref<72x256xf32, #tpu.memory_space<vmem>>, vector<8x256xf32>,
    %83 = vector.extract_strided_slice %62 {offsets = [0, 0], sizes = [8, 256], strides = [1, 1]} : vector<8x512xf32> to vector<8x256xf32>
    %84 = vector.extract_strided_slice %0 {offsets = [4, 0], sizes = [1, 256], strides = [1, 1]} : vector<9x256xf32> to vector<1x256xf32>
    %85 = vector.broadcast %84 : vector<1x256xf32> to vector<8x256xf32>
    %86 = arith.mulf %83, %85 : vector<8x256xf32>
    %c32_31 = arith.constant 32 : index
    %c0_32 = arith.constant 0 : index
    %87 = vector.load %arg10[%c32_31, %c0_32] : memref<72x256xf32, #tpu.memory_space<vmem>>, vector<8x256xf32>
    tpu.vector_store %arg10[%c32_31, %c0_32], %86 {strides = array<i32>} : memref<72x256xf32, #tpu.memory_space<vmem>>, vector<8x256xf32>,
    %88 = vector.extract_strided_slice %62 {offsets = [0, 1], sizes = [8, 256], strides = [1, 1]} : vector<8x512xf32> to vector<8x256xf32>
    %89 = vector.extract_strided_slice %0 {offsets = [5, 0], sizes = [1, 256], strides = [1, 1]} : vector<9x256xf32> to vector<1x256xf32>
    %90 = vector.broadcast %89 : vector<1x256xf32> to vector<8x256xf32>
    %91 = arith.mulf %88, %90 : vector<8x256xf32>
    %c40 = arith.constant 40 : index
    %c0_33 = arith.constant 0 : index
    %92 = vector.load %arg10[%c40, %c0_33] : memref<72x256xf32, #tpu.memory_space<vmem>>, vector<8x256xf32>
    tpu.vector_store %arg10[%c40, %c0_33], %91 {strides = array<i32>} : memref<72x256xf32, #tpu.memory_space<vmem>>, vector<8x256xf32>,
    %93 = vector.extract_strided_slice %62 {offsets = [0, 15], sizes = [8, 256], strides = [1, 1]} : vector<8x512xf32> to vector<8x256xf32>
    %94 = vector.extract_strided_slice %0 {offsets = [6, 0], sizes = [1, 256], strides = [1, 1]} : vector<9x256xf32> to vector<1x256xf32>
    %95 = vector.broadcast %94 : vector<1x256xf32> to vector<8x256xf32>
    %96 = arith.mulf %93, %95 : vector<8x256xf32>
    %c48 = arith.constant 48 : index
    %c0_34 = arith.constant 0 : index
    %97 = vector.load %arg10[%c48, %c0_34] : memref<72x256xf32, #tpu.memory_space<vmem>>, vector<8x256xf32>
    tpu.vector_store %arg10[%c48, %c0_34], %96 {strides = array<i32>} : memref<72x256xf32, #tpu.memory_space<vmem>>, vector<8x256xf32>,
    %98 = vector.extract_strided_slice %62 {offsets = [0, 16], sizes = [8, 256], strides = [1, 1]} : vector<8x512xf32> to vector<8x256xf32>
    %99 = vector.extract_strided_slice %0 {offsets = [7, 0], sizes = [1, 256], strides = [1, 1]} : vector<9x256xf32> to vector<1x256xf32>
    %100 = vector.broadcast %99 : vector<1x256xf32> to vector<8x256xf32>
    %101 = arith.mulf %98, %100 : vector<8x256xf32>
    %c56 = arith.constant 56 : index
    %c0_35 = arith.constant 0 : index
    %102 = vector.load %arg10[%c56, %c0_35] : memref<72x256xf32, #tpu.memory_space<vmem>>, vector<8x256xf32>
    tpu.vector_store %arg10[%c56, %c0_35], %101 {strides = array<i32>} : memref<72x256xf32, #tpu.memory_space<vmem>>, vector<8x256xf32>,
    %103 = vector.extract_strided_slice %62 {offsets = [0, 17], sizes = [8, 256], strides = [1, 1]} : vector<8x512xf32> to vector<8x256xf32>
    %104 = vector.extract_strided_slice %0 {offsets = [8, 0], sizes = [1, 256], strides = [1, 1]} : vector<9x256xf32> to vector<1x256xf32>
    %105 = vector.broadcast %104 : vector<1x256xf32> to vector<8x256xf32>
    %106 = arith.mulf %103, %105 : vector<8x256xf32>
    %c64 = arith.constant 64 : index
    %c0_36 = arith.constant 0 : index
    %107 = vector.load %arg10[%c64, %c0_36] : memref<72x256xf32, #tpu.memory_space<vmem>>, vector<8x256xf32>
    tpu.vector_store %arg10[%c64, %c0_36], %106 {strides = array<i32>} : memref<72x256xf32, #tpu.memory_space<vmem>>, vector<8x256xf32>,
    %c0_37 = arith.constant 0 : index
    %c0_38 = arith.constant 0 : index
    %108 = vector.load %arg5[%c0_37, %c0_38] : memref<8x72xf32, #tpu.memory_space<vmem>>, vector<8x72xf32>
    %c0_39 = arith.constant 0 : index
    %c0_40 = arith.constant 0 : index
    %109 = vector.load %arg10[%c0_39, %c0_40] : memref<72x256xf32, #tpu.memory_space<vmem>>, vector<72x256xf32>
    %cst_41 = arith.constant dense<0.000000e+00> : vector<8x256xf32>
    %110 = tpu.matmul %108, %109, %cst_41 {dimension_numbers = #tpu.dot_dimension_numbers<[1], [0], [0], [1], [0, 0, 1, 1], [], []>} : vector<8x72xf32>, vector<72x256xf32>, vector<8x256xf32> -> vector<8x256xf32>
    %c0_42 = arith.constant 0 : index
    %c0_43 = arith.constant 0 : index
    %111 = vector.load %arg6[%c0_42, %c0_43] : memref<8x1xf32, #tpu.memory_space<vmem>>, vector<8x1xf32>
    %112 = vector.broadcast %111 : vector<8x1xf32> to vector<8x256xf32>
    %113 = arith.addf %110, %112 : vector<8x256xf32>
    %cst_44 = arith.constant 0.000000e+00 : f32
    %114 = vector.broadcast %cst_44 : f32 to vector<8x256xf32>
    %115 = arith.maximumf %113, %114 : vector<8x256xf32>
    %116 = arith.addf %115, %61 : vector<8x256xf32>
    %c0_45 = arith.constant 0 : index
    %c0_46 = arith.constant 0 : index
    %c0_47 = arith.constant 0 : index
    %117 = vector.load %arg8[%c0_45, %c0_46, %c0_47] : memref<1x8x256xf32, #tpu.memory_space<vmem>>, vector<1x8x256xf32>
    %118 = vector.shape_cast %117 : vector<1x8x256xf32> to vector<8x256xf32>
    %119 = vector.shape_cast %116 : vector<8x256xf32> to vector<1x8x256xf32>
    tpu.vector_store %arg8[%c0_45, %c0_46, %c0_47], %119 {strides = array<i32>} : memref<1x8x256xf32, #tpu.memory_space<vmem>>, vector<1x8x256xf32>,
    return
  }
  func.func @transform_0(%arg0: i32) -> (i32, i32) {
    %c0_i32 = arith.constant 0 : i32
    %c0_i32_0 = arith.constant 0 : i32
    %c0_i32_1 = arith.constant 0 : i32
    return %c0_i32, %c0_i32_0 : i32, i32
  }
  func.func @transform_1(%arg0: i32) -> (i32, i32, i32) {
    %c0_i32 = arith.constant 0 : i32
    %c0_i32_0 = arith.constant 0 : i32
    %c0_i32_1 = arith.constant 0 : i32
    return %arg0, %c0_i32, %c0_i32_0 : i32, i32, i32
  }
  func.func @transform_2(%arg0: i32) -> (i32, i32) {
    %c0_i32 = arith.constant 0 : i32
    %c0_i32_0 = arith.constant 0 : i32
    %c0_i32_1 = arith.constant 0 : i32
    return %c0_i32, %c0_i32_0 : i32, i32
  }
  func.func @transform_3(%arg0: i32) -> (i32, i32) {
    %c0_i32 = arith.constant 0 : i32
    %c0_i32_0 = arith.constant 0 : i32
    %c0_i32_1 = arith.constant 0 : i32
    return %c0_i32, %c0_i32_0 : i32, i32
  }
  func.func @transform_4(%arg0: i32) -> (i32, i32) {
    %c0_i32 = arith.constant 0 : i32
    %c0_i32_0 = arith.constant 0 : i32
    %c0_i32_1 = arith.constant 0 : i32
    return %c0_i32, %c0_i32_0 : i32, i32
  }
  func.func @transform_5(%arg0: i32) -> (i32, i32) {
    %c0_i32 = arith.constant 0 : i32
    %c0_i32_0 = arith.constant 0 : i32
    %c0_i32_1 = arith.constant 0 : i32
    return %c0_i32, %c0_i32_0 : i32, i32
  }
  func.func @transform_6(%arg0: i32) -> (i32, i32) {
    %c0_i32 = arith.constant 0 : i32
    %c0_i32_0 = arith.constant 0 : i32
    %c0_i32_1 = arith.constant 0 : i32
    return %c0_i32, %c0_i32_0 : i32, i32
  }
  func.func @transform_7(%arg0: i32) -> (i32, i32, i32) {
    %c0_i32 = arith.constant 0 : i32
    %c0_i32_0 = arith.constant 0 : i32
    %c0_i32_1 = arith.constant 0 : i32
    return %arg0, %c0_i32, %c0_i32_0 : i32, i32, i32
  }
}

</mosaic_0001>

<bundles_post_ra>
// kernel: resblock_forward.1
= control target key start
LH: loop header
LB: loop body
LE: loop exit
PB: predicated region body
PF: predicated region fallthrough
CT: control target
= control target key end

     0   :  { %s1195_s24 = smov 0   ;;  %s1534_s0 = inlined_call_operand.vmem [shape: f32[9,256], index: 0, kind: input, shape index: {}]   ;;  %s1535_s1 = inlined_call_operand.vmem [shape: f32[2,4,256], index: 1, kind: input, shape index: {}]   ;;  %s1536_s2 = inlined_call_operand.vmem [shape: f32[16,36], index: 2, kind: input, shape index: {}]   ;;  %s1537_s3 = inlined_call_operand.vmem [shape: f32[8,1], index: 3, kind: input, shape index: {}]   ;;  %s1538_s4 = inlined_call_operand.vmem [shape: f32[8,72], index: 4, kind: input, shape index: {}]   ;;  %s1539_s5 = inlined_call_operand.vmem [shape: f32[8,1], index: 5, kind: input, shape index: {}]   ;;  %s1540_s6 = inlined_call_operand.vmem [shape: f32[8,1], index: 6, kind: input, shape index: {}]   ;;  %s1541_s7 = inlined_call_operand.vmem [shape: f32[2,8,256], index: 7, kind: output, shape index: {}]  }
   0x1 LB: > { %s1037_s25 = sadd.s32 4294967295, %s1143_s24   ;;  %p1041_p0 = scmp.ge.s32.totalorder %s1143_s24, 1  ;;  %s1143_s24 = sphi %s1195_s24, %s17_s24  }
   0x2   : > { %p237_p1 = scmp.lt.s32.totalorder %s1143_s24, 3 }
   0x4   : > { %p238_p2 = pnand %p1041_p0, %p237_p1 }
   0x5   : > { %v287_v0 = vlaneseq (!%p238_p2)  ;;  %p269_p3 = scmp.lt.s32.totalorder (!%p238_p2), %s1037_s25, 1  ;;  %v279_v2 = vld [vmem:[%s1534_s0] sm:$0xff] (!%p238_p2)  ;;  %v280_v6 = vld [vmem:[%s1534_s0 + $0x8] sm:$0xff] (!%p238_p2)  ;;  %s1145_s11 = smov (!%p238_p2), 127   ;;  %v1047_v30 = vld [vmem:[%s1534_s0 + $0x18] ss:$0 sm:$0xff] (!%p238_p2) }
   0x6   : > { %241 = sbr.rel (%p238_p2) target bundleno = 904 (0x388), region = 48  ;;  %s1146_s12 = smov (!%p238_p2), 112   ;;  %v1046_v31 = vld [vmem:[%s1534_s0 + $0x10] ss:$0 sm:$0xff] (!%p238_p2)  ;;  %vm301_vm0 = vcmask (!%p238_p2), 908288   ;;  %vm380_vm1 = vcmask (!%p238_p2), 924672  }
   0x7   : > { %v288_v1 = vshrl.u32 (!%p238_p2), %v287_v0, 7  ;;  %s1147_s13 = smov (!%p238_p2), 111   ;;  %s1148_s14 = smov (!%p238_p2), 113   ;;  %vm397_vm2 = vcmask (!%p238_p2), 121856   ;;  %vm339_vm3 = vcmask (!%p238_p2), 916480   ;;  %vm418_vm4 = vcmask (!%p238_p2), 1039360  }
   0x8   : > { %s1149_s15 = smov (!%p238_p2), 1   ;;  %s1150_s16 = smov (!%p238_p2), 16   ;;  %vm438_vm5 = vcmask (!%p238_p2), 7168   ;;  %vm359_vm6 = vcmask (!%p238_p2), 130048   ;;  %vm318_vm7 = vcmask (!%p238_p2), 138240   ;;  %vm626_vm8 = vcmask (!%p238_p2), 1043456  }
   0x9   : > { %v406_v3 = vsub.s32 (!%p238_p2), 3, %v288_v1  ;;  %v447_v4 = vsub.s32 (!%p238_p2), 4, %v288_v1  ;;  %v327_v5 = vsub.s32 (!%p238_p2), 1, %v288_v1  ;;  %v289_v15 = vsub.s32 (!%p238_p2), 0, %v288_v1  ;;  %s1151_s17 = smov (!%p238_p2), 15   ;;  %s1152_s22 = smov (!%p238_p2), 17  }
   0xa   : > { %v368_v18 = vsub.s32 (!%p238_p2), 2, %v288_v1  ;;  %v459_v21 = vsub.s32 (!%p238_p2), 5, %v288_v1  ;;  %v534_v24 = vsub.s32 (!%p238_p2), 7, %v288_v1  ;;  %v498_v27 = vsub.s32 (!%p238_p2), 6, %v288_v1 }
   0xb   : > { %v407_v7 = vrot.slane (!%p238_p2), %v279_v2, %v406_v3  ;;  %v1215_v8 = vrot.slane (!%p238_p2), %v279_v2, %v447_v4  ;;  %v328_v9 = vrot.slane (!%p238_p2), %v279_v2, %v327_v5  ;;  %v1219_v11 = vrot.slane (!%p238_p2), %v280_v6, %v447_v4 }
   0xc   : > { %v411_v13 = vrot.slane (!%p238_p2), %v280_v6, %v406_v3  ;;  %v332_v14 = vrot.slane (!%p238_p2), %v280_v6, %v327_v5  ;;  %v294_v16 = vrot.slane (!%p238_p2), %v280_v6, %v289_v15  ;;  %v290_v17 = vrot.slane (!%p238_p2), %v279_v2, %v289_v15 }
   0xd   : > { %s1543_s25 = smov (!%p269_p3, %s1037_s25), 1  ;;  %414 = vrot.lane.b32.xlu1 %v407_v7, %s1145_s11  ;;  %335 = vrot.lane.b32.xlu0 %v328_v9, %s1146_s12  ;;  %v373_v19 = vrot.slane %v280_v6, %v368_v18  ;;  %v369_v20 = vrot.slane %v279_v2, %v368_v18  ;;  %v464_v22 = vrot.slane %v280_v6, %v459_v21  ;;  %vm619_vm9 = vcmask 293888  }
   0xe   : > { %s1055_s28 = sshll.u32 %s1543_s25, 3  ;;  %v460_v23 = vrot.slane %v279_v2, %v459_v21  ;;  %v539_v25 = vrot.slane %v280_v6, %v534_v24  ;;  %v535_v26 = vrot.slane %v279_v2, %v534_v24  ;;  %v503_v28 = vrot.slane %v280_v6, %v498_v27 }
   0xf   : > { %s273_s8 = scalar_lea.vmem %s1535_s1, %s1055_s28  ;;  %v499_v29 = vrot.slane %v279_v2, %v498_v27  ;;  %vm901_vm10 = vcmask 588800  }
  0x10   : > { %v1217_v10 = vld [vmem:[%s273_s8] sm:$0xff] }
  0x11   : > { %v453_v12 = vmul.f32 %v1215_v8, %v1217_v10  ;;  %416 = vrot.lane.b32.xlu1 %v411_v13, %s1145_s11  ;;  %337 = vrot.lane.b32.xlu0 %v332_v14, %s1146_s12  ;;  %v1255_v36 = vcombine.high %v1217_v10, %v1217_v10 }
  0x13   : > { %455 = vst [vmem:[#allocation2 + $0x20] sm:$0xf] %v453_v12  ;;  %v454_v9 = vmul.f32 %v1219_v11, %v1255_v36 }
  0x15   : > { %299 = vrot.lane.b32.xlu1 %v294_v16, %s1147_s13  ;;  %297 = vrot.lane.b32.xlu0 %v290_v17, %s1147_s13  ;;  %456 = vst [vmem:[#allocation2 + $0x28] sm:$0xf] %v454_v9 }
  0x19   : > { %378 = vrot.lane.b32.xlu1 %v373_v19, %s1148_s14  ;;  %376 = vrot.lane.b32.xlu0 %v369_v20, %s1148_s14 }
  0x1d   : > { %469 = vrot.lane.b32.xlu1 %v464_v22, %s1149_s15  ;;  %467 = vrot.lane.b32.xlu0 %v460_v23, %s1149_s15 }
  0x21   : > { %544 = vrot.lane.b32.xlu1 %v539_v25, %s1150_s16  ;;  %542 = vrot.lane.b32.xlu0 %v535_v26, %s1150_s16 }
  0x25   : > { %508 = vrot.lane.b32.xlu1 %v503_v28, %s1151_s17  ;;  %506 = vrot.lane.b32.xlu0 %v499_v29, %s1151_s17 }
  0x29   : > { %583 = vrot.lane.b32.xlu1 %v1047_v30, %s1152_s22  ;;  %581 = vrot.lane.b32.xlu0 %v1046_v31, %s1152_s22 }
  0x7f   : > { %v1245_v32 = vpop.permute.xlu1 %414  ;;  %v1247_v33 = vpop.permute.xlu0 %335 }
  0x80   : > { %v344_v6 = vmul.f32 %v1247_v33, %v1255_v36  ;;  %v423_v15 = vmul.f32 %v1245_v32, %v1255_v36 }
  0x82   : > { %v350_v16 = vrot.slane %v344_v6, 4  ;;  %v429_v20 = vrot.slane %v423_v15, 4 }
  0x83   : > { %v1249_v34 = vpop.permute.xlu1 %416  ;;  %v1251_v35 = vpop.permute.xlu0 %337 }
  0x84   : > { %v1319_v59 = vsel %vm339_vm3, %v1247_v33, %v1251_v35  ;;  %v346_v61 = vmul.f32 %v1251_v35, %v1255_v36  ;;  %v1332_v0 = vsel %vm418_vm4, %v1245_v32, %v1249_v34  ;;  %v425_v1 = vmul.f32 %v1249_v34, %v1255_v36 }
  0x85   : > { %v345_v63 = vmul.f32 %v1319_v59, %v1217_v10  ;;  %v424_v4 = vmul.f32 %v1332_v0, %v1217_v10 }
  0x86   : > { %v352_v2 = vrot.slane %v346_v61, 4  ;;  %v431_v7 = vrot.slane %v425_v1, 4 }
  0x87   : > { %v1257_v37 = vpop.permute.xlu1 %299  ;;  %v1259_v38 = vpop.permute.xlu0 %297  ;;  %v351_v3 = vrot.slane %v345_v63, 4  ;;  %v430_v12 = vrot.slane %v424_v4, 4 }
  0x88   : > { %v308_v39 = vmul.f32 %v1257_v37, %v1255_v36  ;;  %v306_v40 = vmul.f32 %v1259_v38, %v1255_v36  ;;  %v1278_v45 = vsel %vm301_vm0, %v1259_v38, %v1257_v37 }
  0x89   : > { %v307_v48 = vmul.f32 %v1278_v45, %v1217_v10 }
  0x8a   : > { %316 = vrot.lane.b32.xlu1 %v308_v39, %s1152_s22  ;;  %312 = vrot.lane.b32.xlu0 %v306_v40, %s1152_s22  ;;  %v1153_v39 = vmov 0.0   ;;  %v710_v40 = vld [vmem:[%s1537_s3] sm:$0xff] }
  0x8b   : > { %v1267_v41 = vpop.permute.xlu1 %378  ;;  %v1269_v42 = vpop.permute.xlu0 %376  ;;  %697 = vmatprep.mubr.f32.mxu0 %v1153_v39  ;;  %969 = vmatprep.mubr.f32.mxu1 %v1153_v39 }
  0x8c   : > { %v387_v43 = vmul.f32 %v1267_v41, %v1255_v36  ;;  %v385_v44 = vmul.f32 %v1269_v42, %v1255_v36  ;;  %v1291_v49 = vsel %vm380_vm1, %v1269_v42, %v1267_v41 }
  0x8d   : > { %v386_v52 = vmul.f32 %v1291_v49, %v1217_v10 }
  0x8e   : > { %395 = vrot.lane.b32.xlu1 %v387_v43, %s1151_s17  ;;  %391 = vrot.lane.b32.xlu0 %v385_v44, %s1151_s17  ;;  %v1154_v44 = vmov 0  }
  0x8f   : > { %v1282_v46 = vpop.permute.xlu1 %469  ;;  %v1284_v47 = vpop.permute.xlu0 %467  ;;  %1099 = vset.pattern.permute.xlu0 %v1154_v44  ;;  %1135 = vset.pattern.permute.xlu1 %v1154_v44 }
  0x90   : > { %v475_v57 = vmul.f32 %v1284_v47, %v1217_v10  ;;  %v1343_v5 = vsel %vm438_vm5, %v1284_v47, %v1282_v46  ;;  %v477_v19 = vmul.f32 %v1282_v46, %v1217_v10 }
  0x91   : > { %v476_v13 = vmul.f32 %v1343_v5, %v1255_v36 }
  0x92   : > { %314 = vrot.lane.b32.xlu0 %v307_v48, %s1152_s22  ;;  %v481_v62 = vrot.slane %v475_v57, 4  ;;  %v483_v24 = vrot.slane %v477_v19, 4 }
  0x93   : > { %v1294_v50 = vpop.permute.xlu1 %544  ;;  %v1296_v51 = vpop.permute.xlu0 %542  ;;  %v482_v17 = vrot.slane %v476_v13, 4 }
  0x94   : > { %v1356_v14 = vsel %vm359_vm6, %v1296_v51, %v1294_v50  ;;  %v550_v21 = vmul.f32 %v1296_v51, %v1217_v10  ;;  %v552_v23 = vmul.f32 %v1294_v50, %v1217_v10 }
  0x95   : > { %v551_v18 = vmul.f32 %v1356_v14, %v1255_v36 }
  0x96   : > { %393 = vrot.lane.b32.xlu0 %v386_v52, %s1151_s17  ;;  %v556_v27 = vrot.slane %v550_v21, 4  ;;  %v558_v30 = vrot.slane %v552_v23, 4 }
  0x97   : > { %v1301_v53 = vpop.permute.xlu1 %508  ;;  %v1303_v54 = vpop.permute.xlu0 %506  ;;  %v557_v22 = vrot.slane %v551_v18, 4 }
  0x98   : > { %v516_v55 = vmul.f32 %v1301_v53, %v1217_v10  ;;  %v1310_v56 = vsel %vm397_vm2, %v1303_v54, %v1301_v53  ;;  %v514_v60 = vmul.f32 %v1303_v54, %v1217_v10 }
  0x99   : > { %v515_v58 = vmul.f32 %v1310_v56, %v1255_v36 }
  0x9a   : > { %524 = vrot.lane.b32.xlu1 %v516_v55, %s1148_s14 }
  0x9b   : > { %522 = vrot.lane.b32.xlu0 %v515_v58, %s1148_s14  ;;  %v1374_v25 = vpop.permute.xlu1 %583  ;;  %v1376_v26 = vpop.permute.xlu0 %581 }
  0x9c   : > { %v591_v28 = vmul.f32 %v1374_v25, %v1217_v10  ;;  %v1385_v29 = vsel %vm318_vm7, %v1376_v26, %v1374_v25  ;;  %v589_v43 = vmul.f32 %v1376_v26, %v1217_v10 }
  0x9d   : > { %v590_v31 = vmul.f32 %v1385_v29, %v1255_v36 }
  0x9e   : > { %520 = vrot.lane.b32.xlu1 %v514_v60, %s1148_s14 }
  0x9f   : > { %484 = vrot.lane.b32.xlu0 %v481_v62, %s1145_s11 }
  0xa2   : > { %357 = vrot.lane.b32.xlu1 %v352_v2, %s1150_s16 }
  0xa3   : > { %355 = vrot.lane.b32.xlu0 %v351_v3, %s1150_s16 }
  0xa6   : > { %436 = vrot.lane.b32.xlu1 %v431_v7, %s1149_s15 }
  0xa7   : > { %434 = vrot.lane.b32.xlu0 %v430_v12, %s1149_s15 }
  0xaa   : > { %353 = vrot.lane.b32.xlu1 %v350_v16, %s1150_s16 }
  0xab   : > { %486 = vrot.lane.b32.xlu0 %v482_v17, %s1145_s11 }
  0xae   : > { %432 = vrot.lane.b32.xlu1 %v429_v20, %s1149_s15 }
  0xaf   : > { %561 = vrot.lane.b32.xlu0 %v557_v22, %s1146_s12 }
  0xb2   : > { %488 = vrot.lane.b32.xlu1 %v483_v24, %s1145_s11 }
  0xb3   : > { %559 = vrot.lane.b32.xlu0 %v556_v27, %s1146_s12 }
  0xb6   : > { %563 = vrot.lane.b32.xlu1 %v558_v30, %s1146_s12 }
  0xb7   : > { %599 = vrot.lane.b32.xlu0 %v591_v28, %s1147_s13 }
  0xba   : > { %597 = vrot.lane.b32.xlu1 %v590_v31, %s1147_s13 }
  0xbb   : > { %713 = vperm.xlu0 %1099, %v710_v40  }
  0xbe   : > { %595 = vrot.lane.b32.xlu1 %v589_v43, %s1147_s13 }
  0xfc   : > { %v313_v36 = vpop.permute.xlu0 %312  ;;  %v317_v52 = vpop.permute.xlu1 %316 }
 0x100   : > { %v392_v48 = vpop.permute.xlu0 %391  ;;  %v396_v60 = vpop.permute.xlu1 %395 }
 0x104   : > { %v315_v55 = vpop.permute.xlu0 %314 }
 0x105   : > { %v319_v57 = vsel %vm318_vm7, %v313_v36, %v315_v55  ;;  %v320_v58 = vsel %vm318_vm7, %v315_v55, %v317_v52 }
 0x106   : > { %323 = vst [vmem:[#allocation2] sm:$0xf] %v319_v57  ;;  %324 = vst [vmem:[#allocation2 + $0x8] sm:$0xf] %v320_v58 }
 0x108   : > { %v394_v61 = vpop.permute.xlu0 %393 }
 0x109   : > { %v398_v10 = vsel %vm397_vm2, %v392_v48, %v394_v61  ;;  %v399_v62 = vsel %vm397_vm2, %v394_v61, %v396_v60 }
 0x10a   : > { %402 = vst [vmem:[#allocation2 + $0x10] sm:$0xf] %v398_v10  ;;  %403 = vst [vmem:[#allocation2 + $0x18] sm:$0xf] %v399_v62 }
 0x10c   : > { %v525_v63 = vpop.permute.xlu1 %524 }
 0x10d   : > { %v523_v1 = vpop.permute.xlu0 %522 }
 0x10e   : > { %v527_v2 = vsel %vm380_vm1, %v523_v1, %v525_v63 }
 0x10f   : > { %531 = vst [vmem:[#allocation2 + $0x38] sm:$0xf] %v527_v2 }
 0x110   : > { %v521_v3 = vpop.permute.xlu1 %520 }
 0x111   : > { %v526_v4 = vsel %vm380_vm1, %v521_v3, %v523_v1  ;;  %v485_v6 = vpop.permute.xlu0 %484 }
 0x112   : > { %530 = vst [vmem:[#allocation2 + $0x30] sm:$0xf] %v526_v4 }
 0x114   : > { %v358_v7 = vpop.permute.xlu1 %357 }
 0x115   : > { %v356_v9 = vpop.permute.xlu0 %355 }
 0x116   : > { %v361_v12 = vsel %vm359_vm6, %v356_v9, %v358_v7  ;;  %v607_v7 = vld [vmem:[%s1536_s2] sm:$0xff] }
 0x117   : > { %365 = vst [vmem:[#allocation2 + $0x8] sm:$0xf0] %v361_v12  ;;  %v608_v12 = vld [vmem:[%s1536_s2 + $0x8] sm:$0xff] }
 0x118   : > { %v437_v13 = vpop.permute.xlu1 %436 }
 0x119   : > { %v435_v15 = vpop.permute.xlu0 %434 }
 0x11a   : > { %v440_v16 = vsel %vm438_vm5, %v435_v15, %v437_v13 }
 0x11b   : > { %444 = vst [vmem:[#allocation2 + $0x18] sm:$0xf0] %v440_v16 }
 0x11c   : > { %v354_v17 = vpop.permute.xlu1 %353 }
 0x11d   : > { %v360_v18 = vsel %vm359_vm6, %v354_v17, %v356_v9  ;;  %v487_v19 = vpop.permute.xlu0 %486 }
 0x11e   : > { %364 = vst [vmem:[#allocation2] sm:$0xf0] %v360_v18  ;;  %v490_v20 = vsel %vm418_vm4, %v485_v6, %v487_v19  ;;  %v610_v24 = vld [vmem:[#allocation2 + $0x8] sm:$0xff] }
 0x11f   : > { %494 = vst [vmem:[#allocation2 + $0x20] sm:$0xf0] %v490_v20 }
 0x120   : > { %v433_v21 = vpop.permute.xlu1 %432 }
 0x121   : > { %v439_v22 = vsel %vm438_vm5, %v433_v21, %v435_v15  ;;  %v562_v23 = vpop.permute.xlu0 %561 }
 0x122   : > { %443 = vst [vmem:[#allocation2 + $0x10] sm:$0xf0] %v439_v22  ;;  %v612_v27 = vld [vmem:[#allocation2 + $0x18] sm:$0xff] }
 0x123   : > { %v1057_v28 = vpack.c.bf16 %v612_v27, %v610_v24 }
 0x124   : > { %v489_v30 = vpop.permute.xlu1 %488 }
 0x125   : > { %v491_v31 = vsel %vm418_vm4, %v487_v19, %v489_v30  ;;  %1058 = vmatprep.subr.bf16.mxu0 %v1057_v28  ;;  %v560_v40 = vpop.permute.xlu0 %559  ;;  %v609_v48 = vld [vmem:[#allocation2] sm:$0xff] }
 0x126   : > { %495 = vst [vmem:[#allocation2 + $0x28] sm:$0xf0] %v491_v31  ;;  %v565_v43 = vsel %vm339_vm3, %v560_v40, %v562_v23  ;;  %v613_v3 = vld [vmem:[#allocation2 + $0x20] sm:$0xff] }
 0x127   : > { %569 = vst [vmem:[#allocation2 + $0x30] sm:$0xf0] %v565_v43 }
 0x128   : > { %v564_v44 = vpop.permute.xlu1 %563 }
 0x129   : > { %v566_v36 = vsel %vm339_vm3, %v562_v23, %v564_v44  ;;  %v611_v52 = vld [vmem:[#allocation2 + $0x10] sm:$0xff]  ;;  %v600_v55 = vpop.permute.xlu0 %599 }
 0x12a   : > { %570 = vst [vmem:[#allocation2 + $0x38] sm:$0xf0] %v566_v36  ;;  %v1059_v57 = vpack.c.bf16 %v611_v52, %v609_v48 }
 0x12c   : > { %v598_v58 = vpop.permute.xlu1 %597  ;;  %1060 = vmatpush1.bf16.msra.mxu0 %v1059_v57 }
 0x12d   : > { %v602_v60 = vsel %vm301_vm0, %v598_v58, %v600_v55  ;;  %v614_v63 = vld [vmem:[#allocation2 + $0x28] sm:$0xff] }
 0x12e   : > { %606 = vst [vmem:[#allocation2 + $0x48] sm:$0xf] %v602_v60  ;;  %v615_v10 = vld [vmem:[#allocation2 + $0x30] sm:$0xff] }
 0x12f   : > { %v1063_v4 = vpack.c.bf16 %v615_v10, %v613_v3 }
 0x130   : > { %v596_v61 = vpop.permute.xlu1 %595 }
 0x131   : > { %v601_v62 = vsel %vm301_vm0, %v596_v61, %v598_v58  ;;  %v616_v1 = vld [vmem:[#allocation2 + $0x38] sm:$0xff] }
 0x132   : > { %605 = vst [vmem:[#allocation2 + $0x40] sm:$0xf] %v601_v62  ;;  %v1061_v2 = vpack.c.bf16 %v616_v1, %v614_v63 }
 0x134   : > { %1062 = vmatprep.subr.bf16.mxu0 %v1061_v2 }
 0x135   : > { %1064 = vmatpush1.bf16.msra.mxu0 %v1063_v4  ;;  %v618_v6 = vld [vmem:[#allocation2 + $0x48] sm:$0xf] }
 0x136   : > { %1048 = vmatprep.subr.msk.mxu0 %vm626_vm8, %v618_v6 }
 0x139   : > { %v617_v9 = vld [vmem:[#allocation2 + $0x40] sm:$0xf] }
 0x13a   : > { %1049 = vmatpush1.msk.msra.mxu0 %vm626_vm8, %v617_v9  ;;  %v714_v13 = vpop.permute.xlu0 %713 }
 0x13b   : > { %1050 = vmatmul.mubr.msk.f32.vlgmr.msra.gmra.mrb[0].mxu0 %vm619_vm9, %v607_v7 }
 0x13c   : > { %703 = vmatprep.mubr.f32.mxu0 %v1153_v39 }
 0x13f   : > { %1051 = vmatmul.mubr.msk.f32.gmra.mrb[2].mxu0 %vm619_vm9, %v608_v12 }
 0x20e   : > { %v699_v15 = vpop.f32.mrb[0].mxu0 }
 0x20f   : > { %v716_v16 = vadd.f32 %v714_v13, %v699_v15  ;;  %v701_v17 = vpop.f32.mrb[1].mxu0 }
 0x210   : > { %v717_v18 = vadd.f32 %v714_v13, %v701_v17 }
 0x211   : > { %v1423_v19 = vmax.f32 %v716_v16, 0.0 }
 0x212   : > { %v1425_v20 = vmax.f32 %v717_v18, 0.0 }
 0x213   : > { %v822_v21 = vmul.f32 %v1423_v19, %v1303_v54  ;;  %v804_v39 = vmul.f32 %v1423_v19, %v1284_v47  ;;  %v729_v22 = vmul.f32 %v1423_v19, %v1278_v45  ;;  %v765_v23 = vmul.f32 %v1423_v19, %v1291_v49 }
 0x214   : > { %v730_v24 = vmul.f32 %v1425_v20, %v1257_v37  ;;  %v766_v27 = vmul.f32 %v1425_v20, %v1267_v41  ;;  %v747_v28 = vmul.f32 %v1423_v19, %v1319_v59  ;;  %v728_v47 = vmul.f32 %v1425_v20, %v1259_v38 }
 0x215   : > { %828 = vrot.lane.b32.xlu0 %v822_v21, %s1148_s14  ;;  %810 = vrot.lane.b32.xlu1 %v804_v39, %s1145_s11  ;;  %v748_v45 = vmul.f32 %v1425_v20, %v1251_v35  ;;  %v805_v37 = vmul.f32 %v1425_v20, %v1343_v5  ;;  %v806_v41 = vmul.f32 %v1423_v19, %v1282_v46 }
 0x216   : > { %v1100_v49 = vpack.i.bf16 %v730_v24, %v729_v22  ;;  %v1110_v54 = vpack.i.bf16 %v766_v27, %v765_v23  ;;  %v783_v59 = vmul.f32 %v1423_v19, %v1332_v0  ;;  %v784_v31 = vmul.f32 %v1425_v20, %v1249_v34 }
 0x217   : > { %v1105_v30 = vpack.i.bf16 %v748_v45, %v747_v28  ;;  %v823_v38 = vmul.f32 %v1425_v20, %v1310_v56  ;;  %v1120_v40 = vpack.i.bf16 %v806_v41, %v805_v37  ;;  %v824_v35 = vmul.f32 %v1423_v19, %v1301_v53 }
 0x218   : > { %v1115_v5 = vpack.i.bf16 %v784_v31, %v783_v59  ;;  %v841_v46 = vmul.f32 %v1425_v20, %v1356_v14  ;;  %v842_v0 = vmul.f32 %v1423_v19, %v1294_v50  ;;  %v764_v53 = vmul.f32 %v1425_v20, %v1269_v42  ;;  %v1481_v14 = vpop.f32.mrb[2].mxu0 }
 0x219   : > { %734 = vrot.lane.b32.xlu0 %v728_v47, %s1152_s22  ;;  %1101 = vrot.lane.b32.xlu1 %v1100_v49, %s1152_s22  ;;  %v1125_v43 = vpack.i.bf16 %v824_v35, %v823_v38  ;;  %v746_v56 = vmul.f32 %v1425_v20, %v1247_v33  ;;  %v782_v50 = vmul.f32 %v1425_v20, %v1245_v32  ;;  %v1485_v33 = vpop.f32.mrb[3].mxu0 }
 0x21a   : > { %v1130_v34 = vpack.i.bf16 %v842_v0, %v841_v46  ;;  %v859_v42 = vmul.f32 %v1425_v20, %v1385_v29  ;;  %v858_v44 = vmul.f32 %v1423_v19, %v1376_v26  ;;  %v840_v32 = vmul.f32 %v1423_v19, %v1296_v51  ;;  %v720_v29 = vld [vmem:[%s1540_s6] sm:$0xff] }
 0x21b   : > { %v860_v36 = vmul.f32 %v1423_v19, %v1374_v25  ;;  %v895_v26 = vld [vmem:[%s1539_s5] sm:$0xff]  ;;  %v801_v49 = vmul.f32 %v1425_v20, %v1219_v11  ;;  %v800_v38 = vmul.f32 %v1423_v19, %v1215_v8 }
 0x21d   : > { %1111 = vrot.lane.b32.xlu0 %v1110_v54, %s1151_s17  ;;  %1106 = vrot.lane.b32.xlu1 %v1105_v30, %s1150_s16 }
 0x221   : > { %770 = vrot.lane.b32.xlu0 %v764_v53, %s1151_s17  ;;  %752 = vrot.lane.b32.xlu1 %v746_v56, %s1150_s16 }
 0x225   : > { %1121 = vrot.lane.b32.xlu0 %v1120_v40, %s1145_s11  ;;  %1116 = vrot.lane.b32.xlu1 %v1115_v5, %s1149_s15 }
 0x229   : > { %1126 = vrot.lane.b32.xlu0 %v1125_v43, %s1148_s14  ;;  %788 = vrot.lane.b32.xlu1 %v782_v50, %s1149_s15  ;;  %s1056_s14 = sshll.u32 %s1543_s25, 4 }
 0x22a   : > { %s278_s17 = scalar_lea.vmem %s1541_s7, %s1056_s14 }
 0x22d   : > { %866 = vrot.lane.b32.xlu0 %v859_v42, %s1147_s13  ;;  %1131 = vrot.lane.b32.xlu1 %v1130_v34, %s1146_s12  ;;  %v876_v42 = vld [vmem:[%s1538_s4] sm:$0xff] }
 0x231   : > { %864 = vrot.lane.b32.xlu0 %v858_v44, %s1147_s13  ;;  %846 = vrot.lane.b32.xlu1 %v840_v32, %s1146_s12 }
 0x235   : > { %723 = vperm.xlu0 %1099, %v720_v29   ;;  %868 = vrot.lane.b32.xlu1 %v860_v36, %s1147_s13 }
 0x239   : > { %898 = vperm.xlu1 %1135, %v895_v26  }
 0x287   : > { %v829_v51 = vpop.permute.xlu0 %828  ;;  %v811_v48 = vpop.permute.xlu1 %810 }
 0x28b   : > { %v735_v52 = vpop.permute.xlu0 %734  ;;  %v1102_v55 = vpop.permute.xlu1 %1101 }
 0x28c   : > { %v1104_v57 = vunpack.i.h.bf16 %v1102_v55  ;;  %v1103_v58 = vunpack.i.l.bf16 %v1102_v55 }
 0x28e   : > { %v741_v25 = vsel %vm318_vm7, %v1103_v58, %v1104_v57  ;;  %v740_v6 = vsel %vm318_vm7, %v735_v52, %v1103_v58 }
 0x28f   : > { %v1112_v60 = vpop.permute.xlu0 %1111  ;;  %v1107_v61 = vpop.permute.xlu1 %1106 }
 0x290   : > { %v1109_v10 = vunpack.i.h.bf16 %v1107_v61  ;;  %v1108_v62 = vunpack.i.l.bf16 %v1107_v61  ;;  %v1114_v9 = vunpack.i.h.bf16 %v1112_v60  ;;  %v1113_v12 = vunpack.i.l.bf16 %v1112_v60 }
 0x292   : > { %v759_v63 = vsel %vm359_vm6, %v1108_v62, %v1109_v10  ;;  %v777_v39 = vsel %vm397_vm2, %v1113_v12, %v1114_v9 }
 0x293   : > { %v771_v1 = vpop.permute.xlu0 %770  ;;  %v753_v2 = vpop.permute.xlu1 %752  ;;  %v1065_v3 = vpack.c.bf16 %v759_v63, %v741_v25 }
 0x294   : > { %v758_v4 = vsel %vm359_vm6, %v753_v2, %v1108_v62  ;;  %v776_v47 = vsel %vm397_vm2, %v771_v1, %v1113_v12 }
 0x295   : > { %1066 = vmatprep.subr.bf16.mxu1 %v1065_v3  ;;  %v1067_v7 = vpack.c.bf16 %v758_v4, %v740_v6 }
 0x297   : > { %v1122_v13 = vpop.permute.xlu0 %1121  ;;  %v1117_v15 = vpop.permute.xlu1 %1116  ;;  %1068 = vmatpush1.bf16.msra.mxu1 %v1067_v7 }
 0x298   : > { %v1124_v16 = vunpack.i.h.bf16 %v1122_v13  ;;  %v1123_v17 = vunpack.i.l.bf16 %v1122_v13  ;;  %v1119_v18 = vunpack.i.h.bf16 %v1117_v15  ;;  %v1118_v21 = vunpack.i.l.bf16 %v1117_v15 }
 0x29a   : > { %v795_v22 = vsel %vm438_vm5, %v1118_v21, %v1119_v18  ;;  %v817_v28 = vsel %vm418_vm4, %v1123_v17, %v1124_v16  ;;  %v816_v59 = vsel %vm418_vm4, %v811_v48, %v1123_v17 }
 0x29b   : > { %v1127_v23 = vpop.permute.xlu0 %1126  ;;  %v789_v24 = vpop.permute.xlu1 %788  ;;  %v1069_v27 = vpack.c.bf16 %v795_v22, %v777_v39  ;;  %v1073_v30 = vpack.c.bf16 %v817_v28, %v801_v49  ;;  %v1075_v46 = vpack.c.bf16 %v816_v59, %v800_v38 }
 0x29c   : > { %v794_v45 = vsel %vm438_vm5, %v789_v24, %v1118_v21  ;;  %v1129_v37 = vunpack.i.h.bf16 %v1127_v23  ;;  %v1128_v41 = vunpack.i.l.bf16 %v1127_v23 }
 0x29d   : > { %v1071_v54 = vpack.c.bf16 %v794_v45, %v776_v47  ;;  %1070 = vmatprep.subr.bf16.mxu1 %v1069_v27 }
 0x29e   : > { %v835_v0 = vsel %vm380_vm1, %v1128_v41, %v1129_v37  ;;  %v834_v34 = vsel %vm380_vm1, %v829_v51, %v1128_v41 }
 0x29f   : > { %v1132_v31 = vpop.permute.xlu1 %1131  ;;  %1072 = vmatpush1.bf16.msra.mxu1 %v1071_v54  ;;  %v867_v5 = vpop.permute.xlu0 %866 }
 0x2a0   : > { %v1134_v40 = vunpack.i.h.bf16 %v1132_v31  ;;  %v1133_v35 = vunpack.i.l.bf16 %v1132_v31  ;;  %1074 = vmatprep.subr.bf16.mxu1 %v1073_v30 }
 0x2a2   : > { %v853_v11 = vsel %vm339_vm3, %v1133_v35, %v1134_v40 }
 0x2a3   : > { %v847_v20 = vpop.permute.xlu1 %846  ;;  %1076 = vmatpush1.bf16.msra.mxu1 %v1075_v46  ;;  %v1077_v43 = vpack.c.bf16 %v853_v11, %v835_v0  ;;  %v865_v8 = vpop.permute.xlu0 %864 }
 0x2a4   : > { %v852_v53 = vsel %vm339_vm3, %v847_v20, %v1133_v35  ;;  %v870_v44 = vsel %vm301_vm0, %v865_v8, %v867_v5 }
 0x2a5   : > { %v1079_v56 = vpack.c.bf16 %v852_v53, %v834_v34  ;;  %1078 = vmatprep.subr.bf16.mxu1 %v1077_v43 }
 0x2a7   : > { %v869_v19 = vpop.permute.xlu1 %868  ;;  %1080 = vmatpush1.bf16.msra.mxu1 %v1079_v56 }
 0x2a8   : > { %v871_v50 = vsel %vm301_vm0, %v867_v5, %v869_v19 }
 0x2a9   : > { %921 = vmatprep.subr.mxu1 %v871_v50 }
 0x2ab   : > { %922 = vmatpush1.msra.mxu1 %v870_v44 }
 0x2ac   : > { %1052 = vmatmul.mubr.msk.f32.vlgmr.msra.gmra.mrb[0].mxu1 %vm901_vm10, %v876_v42 }
 0x2b4   : > { %v724_v29 = vpop.permute.xlu0 %723 }
 0x2b5   : > { %v726_v52 = vadd.f32 %v724_v29, %v1481_v14  ;;  %v727_v57 = vadd.f32 %v724_v29, %v1485_v33 }
 0x2b8   : > { %v899_v32 = vpop.permute.xlu1 %898 }
 0x37f   : > { %v971_v36 = vpop.f32.mrb[0].mxu1 }
 0x380   : > { %v972_v26 = vadd.f32 %v971_v36, %v899_v32  ;;  %v973_v51 = vpop.f32.mrb[1].mxu1 }
 0x381   : > { %v974_v48 = vadd.f32 %v973_v51, %v899_v32 }
 0x382   : > { %v976_v55 = vmax.f32 %v972_v26, 0.0 }
 0x383   : > { %v977_v58 = vmax.f32 %v974_v48, 0.0 }
 0x384   : > { %v978_v60 = vadd.f32 %v976_v55, %v726_v52 }
 0x385   : > { %v979_v61 = vadd.f32 %v977_v58, %v727_v57 }
 0x386   : > { %980 = vst [vmem:[%s278_s17] sm:$0xff] %v978_v60 }
 0x387   : > { %981 = vst [vmem:[%s278_s17 + $0x8] sm:$0xff] %v979_v61 }
 0x388 PF: > { %s17_s24 = sadd.s32 1, %s1143_s24  }
 0x389   : > { %p14_p4 = scmp.ge.s32.totalorder %s17_s24, 4  }
 0x38b   :  { %16 = sbr.rel (!%p14_p4) target bundleno = 1 (0x1), region = 78 }

</bundles_post_ra>
